<compile_context>
chip_gen: v7x
topology: tpu7x:2x2x1
jax: 0.10.0
libtpu: 0.0.40
codegen_flags: <defaults>
</compile_context>

<pallas_src>
import jax
import jax.numpy as jnp
from jax.experimental import pallas as pl
from jax.experimental.pallas import tpu as pltpu


IN_FEATURES = 784       # 1 x 28 x 28
HIDDEN = 32             # args.hidden_elements
N_CLASSES = 10
OUT_P = 128             # classes padded to a full 128-lane width (softmax tile)


# ----------------------------------------------------------------------------
# Fused kernel: complex fc1 -> complex out -> magnitude -> masked log_softmax
# ----------------------------------------------------------------------------
def complexnet_kernel(xr_ref, xi_ref, w1_ref, w2_ref,
                      logp_ref, hid_ref, out_ref):
    # bf16 casts happen on the VPU in-kernel (no wrapper-side cast/copy).
    xr = xr_ref[...].astype(jnp.bfloat16)                     # [B, 784]
    xi = xi_ref[...].astype(jnp.bfloat16)                     # [B, 784]
    w1 = w1_ref[...]                                          # [784, 64] = [Wr|Wi]

    # ---- layer 1: two half-K MXU matmuls + free VPU add/sub epilogue ----
    a = jnp.dot(xr, w1, preferred_element_type=jnp.float32)   # [xr@Wr | xr@Wi]
    b = jnp.dot(xi, w1, preferred_element_type=jnp.float32)   # [xi@Wr | xi@Wi]
    hr = a[:, :HIDDEN] - b[:, HIDDEN:]                        # xr@Wr - xi@Wi
    hi = a[:, HIDDEN:] + b[:, :HIDDEN]                        # xr@Wi + xi@Wr
    h_cat = jnp.concatenate([hr, hi], axis=1)                 # [B, 64] f32
    hid_ref[...] = h_cat

    # ---- layer 2: single MXU matmul with block weight [[Wr,Wi],[-Wi,Wr]] ----
    o_cat = jnp.dot(h_cat.astype(jnp.bfloat16), w2_ref[...],
                    preferred_element_type=jnp.float32)       # [B, 2*OUT_P] f32
    out_ref[...] = o_cat

    # ---- magnitude + log_softmax over the first N_CLASSES lanes ----
    out_r = o_cat[:, :OUT_P]
    out_i = o_cat[:, OUT_P:]
    mag = jnp.sqrt(out_r * out_r + out_i * out_i)             # [B, OUT_P]
    col = jax.lax.broadcasted_iota(jnp.int32, mag.shape, 1)
    valid = col < N_CLASSES
    mag_m = jnp.where(valid, mag, -jnp.inf)                   # mask padded lanes
    mx = jnp.max(mag_m, axis=1, keepdims=True)
    shifted = mag_m - mx
    probs = jnp.where(valid, jnp.exp(shifted), 0.0)           # exclude pads
    lse = jnp.log(jnp.sum(probs, axis=1, keepdims=True))
    # write 0.0 (not -inf) in padded lanes so the padded buffer is Inf/NaN free
    logp_ref[...] = jnp.where(valid, shifted - lse, 0.0).astype(logp_ref.dtype)


# ----------------------------------------------------------------------------
# Parameters: PyTorch-Linear-style init + one-time compact bf16 repack
# ----------------------------------------------------------------------------
class ComplexNetParams:
    def __init__(self, key, in_features=IN_FEATURES, hidden=HIDDEN, out=N_CLASSES):
        k = jax.random.split(key, 4)
        b1 = 1.0 / jnp.sqrt(in_features)
        b2 = 1.0 / jnp.sqrt(hidden)
        # stored as [in, out]  (== PyTorch weight.T), f32 masters
        self.fc1_wr = jax.random.uniform(k[0], (in_features, hidden),
                                         jnp.float32, -b1, b1)
        self.fc1_wi = jax.random.uniform(k[1], (in_features, hidden),
                                         jnp.float32, -b1, b1)
        self.out_wr = jax.random.uniform(k[2], (hidden, out),
                                         jnp.float32, -b2, b2)
        self.out_wi = jax.random.uniform(k[3], (hidden, out),
                                         jnp.float32, -b2, b2)

        # --- layer 1: no padding, no duplication: [Wr | Wi] -> [784, 64] bf16 ---
        self.w1_packed = jnp.concatenate(
            [self.fc1_wr, self.fc1_wi], axis=1).astype(jnp.bfloat16)      # ~100 KB

        # --- layer 2: block [[Wr,Wi],[-Wi,Wr]], only class dim padded 10->128 ---
        w2r = jnp.pad(self.out_wr, ((0, 0), (0, OUT_P - out)))            # [32, 128]
        w2i = jnp.pad(self.out_wi, ((0, 0), (0, OUT_P - out)))            # [32, 128]
        self.w2_block = jnp.concatenate(
            [jnp.concatenate([w2r, w2i], axis=1),
             jnp.concatenate([-w2i, w2r], axis=1)], axis=0
        ).astype(jnp.bfloat16)                                            # [64, 256]


# ----------------------------------------------------------------------------
# ComplexNet forward (thin glue in JAX, whole hot path in one Pallas call)
# ----------------------------------------------------------------------------
def complexnet_forward(params, x_complex, *, batch_tile=256):
    """x_complex: complex64 array of shape [B, 1, 28, 28] (NCHW, like PyTorch)."""
    B = x_complex.shape[0]
    inpt_x = x_complex.reshape(B, -1)                         # [B, 784] complex
    xr = jnp.real(inpt_x).astype(jnp.float32)                 # [B, 784]
    xi = jnp.imag(inpt_x).astype(jnp.float32)                 # [B, 784]

    out_shapes = (
        jax.ShapeDtypeStruct((B, OUT_P), jnp.float32),        # logp (lane-padded)
        jax.ShapeDtypeStruct((B, 2 * HIDDEN), jnp.float32),   # h_cat = hr|hi
        jax.ShapeDtypeStruct((B, 2 * OUT_P), jnp.float32),    # o_cat = or|oi (padded)
    )

    # Advisory cost hint for XLA scheduling around the custom call.
    flops = 4 * B * IN_FEATURES * (2 * HIDDEN) + 2 * B * (2 * HIDDEN) * (2 * OUT_P)
    bytes_accessed = ((IN_FEATURES * 2 * HIDDEN + 2 * HIDDEN * 2 * OUT_P) * 2  # weights bf16
                      + 2 * B * IN_FEATURES * 4                               # xr, xi f32
                      + B * (OUT_P + 2 * HIDDEN + 2 * OUT_P) * 4)             # outputs f32
    cost = pl.CostEstimate(flops=flops, transcendentals=2 * B * OUT_P,
                           bytes_accessed=bytes_accessed)

    if B <= batch_tile:
        # Small batch: single invocation, whole-array VMEM blocks, no grid.
        vmem = pl.BlockSpec(memory_space=pltpu.MemorySpace.VMEM)
        logp_p, h_cat, o_cat = pl.pallas_call(
            complexnet_kernel,
            out_shape=out_shapes,
            in_specs=[vmem, vmem, vmem, vmem],
            out_specs=(vmem, vmem, vmem),
            cost_estimate=cost,
        )(xr, xi, params.w1_packed, params.w2_block)
    else:
        # Large batch: batch-tiled "parallel" grid (double-buffered pipelining,
        # both TensorCores on v7x); weights whole-array resident (index_map -> 0).
        TB = batch_tile
        grid_spec = pltpu.PrefetchScalarGridSpec(
            num_scalar_prefetch=0,
            grid=(pl.cdiv(B, TB),),
            in_specs=[
                pl.BlockSpec((TB, IN_FEATURES), lambda i: (i, 0)),
                pl.BlockSpec((TB, IN_FEATURES), lambda i: (i, 0)),
                pl.BlockSpec((IN_FEATURES, 2 * HIDDEN), lambda i: (0, 0)),
                pl.BlockSpec((2 * HIDDEN, 2 * OUT_P), lambda i: (0, 0)),
            ],
            out_specs=(
                pl.BlockSpec((TB, OUT_P), lambda i: (i, 0)),
                pl.BlockSpec((TB, 2 * HIDDEN), lambda i: (i, 0)),
                pl.BlockSpec((TB, 2 * OUT_P), lambda i: (i, 0)),
            ),
        )
        logp_p, h_cat, o_cat = pl.pallas_call(
            complexnet_kernel,
            out_shape=out_shapes,
            grid_spec=grid_spec,
            compiler_params=pltpu.CompilerParams(
                dimension_semantics=("parallel",)),
            cost_estimate=cost,
        )(xr, xi, params.w1_packed, params.w2_block)

    logp = logp_p[:, :N_CLASSES]
    hidden_x = h_cat[:, :HIDDEN] + 1j * h_cat[:, HIDDEN:]                # complex64
    out_x = o_cat[:, :N_CLASSES] + 1j * o_cat[:, OUT_P:OUT_P + N_CLASSES]
    return logp, inpt_x, hidden_x, out_x


if __name__ == "__main__":
    key = jax.random.PRNGKey(0)
    kx, kp = jax.random.split(key)

    # module-consistent shapes: batch=2, 1x28x28 complex image -> 784,
    # hidden_elements=32, 10 classes.
    B, H, W = 2, 28, 28
    kr, ki = jax.random.split(kx)
    x_real = jax.random.normal(kr, (B, 1, H, W), jnp.float32)
    x_imag = jax.random.normal(ki, (B, 1, H, W), jnp.float32)
    x = (x_real + 1j * x_imag).astype(jnp.complex64)

    params = ComplexNetParams(kp)

    logp, inpt_x, hidden_x, out_x = complexnet_forward(params, x)
    jax.block_until_ready((logp, inpt_x, hidden_x, out_x))

    # shape / API checks (same return signature as the PyTorch module)
    assert logp.shape == (B, N_CLASSES)
    assert inpt_x.shape == (B, IN_FEATURES) and jnp.iscomplexobj(inpt_x)
    assert hidden_x.shape == (B, HIDDEN) and jnp.iscomplexobj(hidden_x)
    assert out_x.shape == (B, N_CLASSES) and jnp.iscomplexobj(out_x)
    # log_softmax rows must sum (in prob space) to ~1
    assert jnp.allclose(jnp.sum(jnp.exp(logp), axis=1), 1.0, atol=1e-4)
    # no Inf/NaN anywhere (padded lanes were written as 0.0)
    assert bool(jnp.all(jnp.isfinite(logp)))

    # numerical check vs. a plain-JAX f32 reference (bf16 MXU operands -> loose tol)
    xr = jnp.real(inpt_x).astype(jnp.float32)
    xi = jnp.imag(inpt_x).astype(jnp.float32)
    hr = xr @ params.fc1_wr - xi @ params.fc1_wi
    hi = xr @ params.fc1_wi + xi @ params.fc1_wr
    orr = hr @ params.out_wr - hi @ params.out_wi
    oii = hr @ params.out_wi + hi @ params.out_wr
    mag_ref = jnp.sqrt(orr * orr + oii * oii)
    logp_ref = jax.nn.log_softmax(mag_ref, axis=1)
    assert jnp.allclose(logp, logp_ref, atol=5e-2), \
        float(jnp.max(jnp.abs(logp - logp_ref)))
    assert jnp.allclose(jnp.real(hidden_x), hr, atol=5e-2)
    assert jnp.allclose(jnp.imag(hidden_x), hi, atol=5e-2)

    print("KERNEL_OK")
</pallas_src>

<mosaic_0001>
module attributes {stable_mosaic.version = 11 : i64} {
  func.func @complexnet_kernel(%arg0: memref<2x784xf32, #tpu.memory_space<vmem>>, %arg1: memref<2x784xf32, #tpu.memory_space<vmem>>, %arg2: memref<784x64xbf16, #tpu.memory_space<vmem>>, %arg3: memref<64x256xbf16, #tpu.memory_space<vmem>>, %arg4: memref<2x128xf32, #tpu.memory_space<vmem>>, %arg5: memref<2x64xf32, #tpu.memory_space<vmem>>, %arg6: memref<2x256xf32, #tpu.memory_space<vmem>>) attributes {dimension_semantics = [], scalar_prefetch = 0 : i64, scratch_operands = 0 : i64, tpu.core_type = #tpu.core_type<tc>} {
    %c0 = arith.constant 0 : index
    %c0_0 = arith.constant 0 : index
    %0 = vector.load %arg0[%c0, %c0_0] : memref<2x784xf32, #tpu.memory_space<vmem>>, vector<2x784xf32>
    %1 = arith.truncf %0 : vector<2x784xf32> to vector<2x784xbf16>
    %c0_1 = arith.constant 0 : index
    %c0_2 = arith.constant 0 : index
    %2 = vector.load %arg1[%c0_1, %c0_2] : memref<2x784xf32, #tpu.memory_space<vmem>>, vector<2x784xf32>
    %3 = arith.truncf %2 : vector<2x784xf32> to vector<2x784xbf16>
    %c0_3 = arith.constant 0 : index
    %c0_4 = arith.constant 0 : index
    %4 = vector.load %arg2[%c0_3, %c0_4] : memref<784x64xbf16, #tpu.memory_space<vmem>>, vector<784x64xbf16>
    %cst = arith.constant dense<0.000000e+00> : vector<2x64xf32>
    %5 = tpu.matmul %1, %4, %cst {dimension_numbers = #tpu.dot_dimension_numbers<[1], [0], [0], [1], [0, 0, 1, 1], [], []>} : vector<2x784xbf16>, vector<784x64xbf16>, vector<2x64xf32> -> vector<2x64xf32>
    %cst_5 = arith.constant dense<0.000000e+00> : vector<2x64xf32>
    %6 = tpu.matmul %3, %4, %cst_5 {dimension_numbers = #tpu.dot_dimension_numbers<[1], [0], [0], [1], [0, 0, 1, 1], [], []>} : vector<2x784xbf16>, vector<784x64xbf16>, vector<2x64xf32> -> vector<2x64xf32>
    %7 = vector.extract_strided_slice %5 {offsets = [0, 0], sizes = [2, 32], strides = [1, 1]} : vector<2x64xf32> to vector<2x32xf32>
    %8 = vector.extract_strided_slice %6 {offsets = [0, 32], sizes = [2, 32], strides = [1, 1]} : vector<2x64xf32> to vector<2x32xf32>
    %9 = arith.subf %7, %8 : vector<2x32xf32>
    %10 = vector.extract_strided_slice %5 {offsets = [0, 32], sizes = [2, 32], strides = [1, 1]} : vector<2x64xf32> to vector<2x32xf32>
    %11 = vector.extract_strided_slice %6 {offsets = [0, 0], sizes = [2, 32], strides = [1, 1]} : vector<2x64xf32> to vector<2x32xf32>
    %12 = arith.addf %10, %11 : vector<2x32xf32>
    %13 = tpu.concatenate %9, %12 in 1 : vector<2x32xf32>, vector<2x32xf32> -> vector<2x64xf32>
    %c0_6 = arith.constant 0 : index
    %c0_7 = arith.constant 0 : index
    %14 = vector.load %arg5[%c0_6, %c0_7] : memref<2x64xf32, #tpu.memory_space<vmem>>, vector<2x64xf32>
    tpu.vector_store %arg5[%c0_6, %c0_7], %13 {strides = array<i32>} : memref<2x64xf32, #tpu.memory_space<vmem>>, vector<2x64xf32>,
    %15 = arith.truncf %13 : vector<2x64xf32> to vector<2x64xbf16>
    %c0_8 = arith.constant 0 : index
    %c0_9 = arith.constant 0 : index
    %16 = vector.load %arg3[%c0_8, %c0_9] : memref<64x256xbf16, #tpu.memory_space<vmem>>, vector<64x256xbf16>
    %cst_10 = arith.constant dense<0.000000e+00> : vector<2x256xf32>
    %17 = tpu.matmul %15, %16, %cst_10 {dimension_numbers = #tpu.dot_dimension_numbers<[1], [0], [0], [1], [0, 0, 1, 1], [], []>} : vector<2x64xbf16>, vector<64x256xbf16>, vector<2x256xf32> -> vector<2x256xf32>
    %c0_11 = arith.constant 0 : index
    %c0_12 = arith.constant 0 : index
    %18 = vector.load %arg6[%c0_11, %c0_12] : memref<2x256xf32, #tpu.memory_space<vmem>>, vector<2x256xf32>
    tpu.vector_store %arg6[%c0_11, %c0_12], %17 {strides = array<i32>} : memref<2x256xf32, #tpu.memory_space<vmem>>, vector<2x256xf32>,
    %19 = vector.extract_strided_slice %17 {offsets = [0, 0], sizes = [2, 128], strides = [1, 1]} : vector<2x256xf32> to vector<2x128xf32>
    %20 = vector.extract_strided_slice %17 {offsets = [0, 128], sizes = [2, 128], strides = [1, 1]} : vector<2x256xf32> to vector<2x128xf32>
    %21 = arith.mulf %19, %19 : vector<2x128xf32>
    %22 = arith.mulf %20, %20 : vector<2x128xf32>
    %23 = arith.addf %21, %22 : vector<2x128xf32>
    %24 = math.sqrt %23 : vector<2x128xf32>
    %25 = tpu.iota {dimensions = array<i32: 1>} : vector<2x128xi32>
    %c10_i32 = arith.constant 10 : i32
    %26 = vector.broadcast %c10_i32 : i32 to vector<2x128xi32>
    %27 = arith.cmpi slt, %25, %26 : vector<2x128xi32>
    %cst_13 = arith.constant 0xFF800000 : f32
    %28 = vector.broadcast %cst_13 : f32 to vector<2x128xf32>
    %29 = arith.select %27, %24, %28 : vector<2x128xi1>, vector<2x128xf32>
    %cst_14 = arith.constant dense<0xFF800000> : vector<2xf32>
    %30 = vector.multi_reduction <maximumf>, %29, %cst_14 [1] : vector<2x128xf32> to vector<2xf32>
    %31 = vector.shape_cast %30 : vector<2xf32> to vector<2x1xf32>
    %32 = vector.broadcast %31 : vector<2x1xf32> to vector<2x128xf32>
    %33 = arith.subf %29, %32 : vector<2x128xf32>
    %34 = math.exp %33 : vector<2x128xf32>
    %cst_15 = arith.constant 0.000000e+00 : f32
    %35 = vector.broadcast %cst_15 : f32 to vector<2x128xf32>
    %36 = arith.select %27, %34, %35 : vector<2x128xi1>, vector<2x128xf32>
    %cst_16 = arith.constant dense<0.000000e+00> : vector<2xf32>
    %37 = vector.multi_reduction <add>, %36, %cst_16 [1] : vector<2x128xf32> to vector<2xf32>
    %38 = vector.shape_cast %37 : vector<2xf32> to vector<2x1xf32>
    %39 = math.log %38 : vector<2x1xf32>
    %40 = vector.broadcast %39 : vector<2x1xf32> to vector<2x128xf32>
    %41 = arith.subf %33, %40 : vector<2x128xf32>
    %cst_17 = arith.constant 0.000000e+00 : f32
    %42 = vector.broadcast %cst_17 : f32 to vector<2x128xf32>
    %43 = arith.select %27, %41, %42 : vector<2x128xi1>, vector<2x128xf32>
    %c0_18 = arith.constant 0 : index
    %c0_19 = arith.constant 0 : index
    %44 = vector.load %arg4[%c0_18, %c0_19] : memref<2x128xf32, #tpu.memory_space<vmem>>, vector<2x128xf32>
    tpu.vector_store %arg4[%c0_18, %c0_19], %43 {strides = array<i32>} : memref<2x128xf32, #tpu.memory_space<vmem>>, vector<2x128xf32>,
    return
  }
}

</mosaic_0001>

<bundles_post_ra>
// kernel: tpu_custom_call.1
= control target key start
LH: loop header
LB: loop body
LE: loop exit
PB: predicated region body
PF: predicated region fallthrough
CT: control target
= control target key end

     0   :  { %12 = vsyncpa [#allocation3], 0  ;;  %v31_v28 = vlaneseq  ;;  %v1393_v36 = vmov 1983009808   ;;  %v1394_v38 = vmov 0.0   ;;  %vm1395_vm0 = vmmov 0   ;;  %s1853_s0 = inlined_call_operand.vmem [shape: f32[2,784], index: 0, kind: input, shape index: {}]   ;;  %s1854_s1 = inlined_call_operand.vmem [shape: f32[2,784], index: 1, kind: input, shape index: {}]   ;;  %s1855_s2 = inlined_call_operand.vmem [shape: bf16[784,64], index: 2, kind: input, shape index: {}]   ;;  %s1856_s3 = inlined_call_operand.vmem [shape: bf16[64,256], index: 3, kind: input, shape index: {}]   ;;  %s1857_s4 = inlined_call_operand.hbm [shape: f32[2,128], index: 4, kind: output, shape index: {0}]   ;;  %s1858_s5 = inlined_call_operand.hbm [shape: f32[2,64], index: 5, kind: output, shape index: {1}]   ;;  %s1859_s6 = inlined_call_operand.hbm [shape: f32[2,256], index: 6, kind: output, shape index: {2}]  }
   0x1   :  { %v1440_v0 = vld [vmem:[%s1855_s2 + $0x40] sm:$0xff]   ;;  %v1463_v4 = vld [vmem:[%s1855_s2 + $0x48] sm:$0xff]   ;;  %v1487_v8 = vld [vmem:[%s1855_s2 + $0x50] sm:$0xff]   ;;  %v29_v37 = vunpack.c.l.s4 %v1393_v36  ;;  %vm517_vm1 = vcmask 130048  }
   0x2   :  { %v1445_v1 = vld [vmem:[%s1855_s2 + $0xc0] sm:$0xff]   ;;  %1095 = vmatprep.subr.bf16.mxu0 %v1440_v0  ;;  %v1469_v5 = vld [vmem:[%s1855_s2 + $0xc8] sm:$0xff]   ;;  %v1493_v9 = vld [vmem:[%s1855_s2 + $0xd0] sm:$0xff]   ;;  %v32_v33 = vshrl.u32 %v31_v28, 7 }
   0x3   :  { %v1451_v2 = vld [vmem:[%s1855_s2] sm:$0xff]   ;;  %1117 = vmatprep.subr.bf16.mxu1 %v1445_v1  ;;  %v1475_v6 = vld [vmem:[%s1855_s2 + $0x8] sm:$0xff]   ;;  %v1499_v10 = vld [vmem:[%s1855_s2 + $0x10] sm:$0xff]   ;;  %v30_v39 = vunpack.c.0.s8 %v29_v37 }
   0x4   :  { %v1457_v3 = vld [vmem:[%s1855_s2 + $0x80] sm:$0xff]   ;;  %1096 = vmatpush3.bf16.msra.mxu0 %v1451_v2  ;;  %v1481_v7 = vld [vmem:[%s1855_s2 + $0x88] sm:$0xff]   ;;  %v1505_v11 = vld [vmem:[%s1855_s2 + $0x90] sm:$0xff]  }
   0x5   :  { %1118 = vmatpush3.bf16.msra.mxu1 %v1457_v3  ;;  %1097 = vmatprep.subr.bf16.mxu0 %v1463_v4  ;;  %v1511_v12 = vld [vmem:[%s1855_s2 + $0x58] sm:$0xff]   ;;  %v1535_v16 = vld [vmem:[%s1855_s2 + $0x60] sm:$0xff]   ;;  %v1559_v20 = vld [vmem:[%s1855_s2 + $0x68] sm:$0xff]   ;;  %v1640_v41 = vsub.s32 %v30_v39, %v32_v33 }
   0x6   :  { %1119 = vmatprep.subr.bf16.mxu1 %v1469_v5  ;;  %v1517_v13 = vld [vmem:[%s1855_s2 + $0xd8] sm:$0xff]   ;;  %v1541_v17 = vld [vmem:[%s1855_s2 + $0xe0] sm:$0xff]   ;;  %v1565_v21 = vld [vmem:[%s1855_s2 + $0xe8] sm:$0xff]  }
   0x7   :  { %v1523_v14 = vld [vmem:[%s1855_s2 + $0x18] sm:$0xff]   ;;  %v1547_v18 = vld [vmem:[%s1855_s2 + $0x20] sm:$0xff]   ;;  %v1571_v22 = vld [vmem:[%s1855_s2 + $0x28] sm:$0xff]  }
   0x8   :  { %1098 = vmatpush3.bf16.msra.mxu0 %v1475_v6  ;;  %v1529_v15 = vld [vmem:[%s1855_s2 + $0x98] sm:$0xff]   ;;  %v1553_v19 = vld [vmem:[%s1855_s2 + $0xa0] sm:$0xff]   ;;  %v1577_v23 = vld [vmem:[%s1855_s2 + $0xa8] sm:$0xff]  }
   0x9   :  { %1120 = vmatpush3.bf16.msra.mxu1 %v1481_v7  ;;  %1099 = vmatprep.subr.bf16.mxu0 %v1487_v8  ;;  %v1583_v24 = vld [vmem:[%s1855_s2 + $0x70] sm:$0xff]   ;;  %v1607_v29 = vld [vmem:[%s1855_s2 + $0x78] sm:$0xff]   ;;  %v23_v34 = vld [vmem:[%s1853_s0] sm:$0xff] }
   0xa   :  { %1121 = vmatprep.subr.bf16.mxu1 %v1493_v9  ;;  %v1589_v25 = vld [vmem:[%s1855_s2 + $0xf0] sm:$0xff]   ;;  %v1613_v30 = vld [vmem:[%s1855_s2 + $0xf8] sm:$0xff]   ;;  %v1635_v35 = vld [vmem:[%s1855_s2 + $0x140] sm:$0xff]   ;;  %v27_v40 = vcombine.high %v23_v34, %v23_v34  ;;  %v34_v43 = vrot.slane %v23_v34, %v1640_v41 }
   0xb   :  { %v1595_v26 = vld [vmem:[%s1855_s2 + $0x30] sm:$0xff]   ;;  %v1619_v31 = vld [vmem:[%s1855_s2 + $0x38] sm:$0xff]   ;;  %v24_v42 = vld [vmem:[%s1853_s0 + $0x8] sm:$0x3f] }
   0xc   :  { %1100 = vmatpush3.bf16.msra.mxu0 %v1499_v10  ;;  %v1601_v27 = vld [vmem:[%s1855_s2 + $0xb0] sm:$0xff]   ;;  %v1625_v32 = vld [vmem:[%s1855_s2 + $0xb8] sm:$0xff]   ;;  %v41_v44 = vrot.slane %v27_v40, %v1640_v41  ;;  %v1648_v45 = vrot.slane %v24_v42, %v1640_v41  ;;  %v42_v46 = vcombine.high %v34_v43, %v34_v43  ;;  %v67_v48 = vpack.c.bf16 %v34_v43, %v34_v43  ;;  %v1653_v50 = vld [vmem:[%s1855_s2 + $0x100] sm:$0xff]  }
   0xd   :  { %1122 = vmatpush3.bf16.msra.mxu1 %v1505_v11  ;;  %1101 = vmatprep.subr.bf16.mxu0 %v1511_v12  ;;  %v44_v51 = vcombine.high %v24_v42, %v24_v42  ;;  %v1660_v55 = vld [vmem:[%s1855_s2 + $0x180] sm:$0xff]   ;;  %v1665_v56 = vld [vmem:[%s1855_s2 + $0x148] sm:$0xff]   ;;  %v1681_v60 = vld [vmem:[%s1855_s2 + $0x150] sm:$0xff]  }
   0xe   :  { %1123 = vmatprep.subr.bf16.mxu1 %v1517_v13  ;;  %v43_v47 = vcombine.high %v41_v44, %v41_v44  ;;  %v69_v49 = vpack.c.bf16 %v41_v44, %v41_v44  ;;  %v59_v52 = vcombine.high %v1648_v45, %v1648_v45  ;;  %v68_v53 = vpack.c.bf16 %v42_v46, %v42_v46  ;;  %v1673_v59 = vld [vmem:[%s1855_s2 + $0x108] sm:$0xff]   ;;  %v1687_v61 = vld [vmem:[%s1855_s2 + $0x110] sm:$0xff]   ;;  %v74_v62 = vld [vmem:[%s1854_s1] sm:$0xff] }
   0xf   :  { %v58_v58 = vrot.slane %v44_v51, %v1640_v41  ;;  %v1695_v33 = vld [vmem:[%s1855_s2 + $0x158] sm:$0xff]   ;;  %v85_v34 = vrot.slane %v74_v62, %v1640_v41 }
  0x10   :  { %1102 = vmatpush3.bf16.msra.mxu0 %v1523_v14  ;;  %v70_v54 = vpack.c.bf16 %v43_v47, %v43_v47  ;;  %553 = vmatprep.mubr.bf16.mxu0 %v68_v53  ;;  %v72_v57 = vpack.c.bf16 %v59_v52, %v59_v52 }
  0x11   :  { %1124 = vmatpush3.bf16.msra.mxu1 %v1529_v15  ;;  %1103 = vmatprep.subr.bf16.mxu0 %v1535_v16  ;;  %v73_v63 = vpack.c.bf16 %v58_v58, %v58_v58 }
  0x12   :  { %1125 = vmatprep.subr.bf16.mxu1 %v1541_v17  ;;  %593 = vmatprep.mubr.bf16.mxu1 %v70_v54 }
  0x14   :  { %1104 = vmatpush3.bf16.msra.mxu0 %v1547_v18 }
  0x15   :  { %1126 = vmatpush3.bf16.msra.mxu1 %v1553_v19  ;;  %1105 = vmatprep.subr.bf16.mxu0 %v1559_v20 }
  0x16   :  { %1127 = vmatprep.subr.bf16.mxu1 %v1565_v21 }
  0x18   :  { %1106 = vmatpush3.bf16.msra.mxu0 %v1571_v22 }
  0x19   :  { %1128 = vmatpush3.bf16.msra.mxu1 %v1577_v23  ;;  %1107 = vmatprep.subr.bf16.mxu0 %v1583_v24 }
  0x1a   :  { %1129 = vmatprep.subr.bf16.mxu1 %v1589_v25 }
  0x1c   :  { %1108 = vmatpush3.bf16.msra.mxu0 %v1595_v26 }
  0x1d   :  { %1130 = vmatpush3.bf16.msra.mxu1 %v1601_v27  ;;  %1109 = vmatprep.subr.bf16.mxu0 %v1607_v29 }
  0x1e   :  { %1131 = vmatprep.subr.bf16.mxu1 %v1613_v30 }
  0x20   :  { %1110 = vmatpush3.bf16.msra.mxu0 %v1619_v31 }
  0x21   :  { %1132 = vmatpush3.bf16.msra.mxu1 %v1625_v32  ;;  %1139 = vmatprep.subr.bf16.mxu0 %v1635_v35 }
  0x22   :  { %1231 = vmatprep.subr.bf16.mxu1 %v1394_v38 }
  0x23   :  { %554 = vmatmul.mubr.bf16.vlgmr.msra.gmra.mrb[0].mxu0 %v67_v48 }
  0x24   :  { %594 = vmatmul.mubr.bf16.vlgmr.msra.gmra.mrb[0].mxu1 %v69_v49  ;;  %1140 = vmatpush3.bf16.msra.mxu0 %v1653_v50 }
  0x25   :  { %1232 = vmatpush3.bf16.msra.mxu1 %v1660_v55  ;;  %1141 = vmatprep.subr.bf16.mxu0 %v1665_v56 }
  0x26   :  { %1233 = vmatprep.mubr.msk.bf16.mxu1 %vm1395_vm0, %v1394_v38  ;;  %1163 = vmatprep.subr.bf16.mxu1 %v1440_v0  ;;  %v93_v0 = vcombine.high %v85_v34, %v85_v34 }
  0x27   :  { %633 = vmatprep.mubr.bf16.mxu0 %v72_v57 }
  0x28   :  { %1142 = vmatpush3.bf16.msra.mxu0 %v1673_v59 }
  0x29   :  { %1143 = vmatprep.subr.bf16.mxu0 %v1681_v60 }
  0x2a   :  { %13 = vsyncpa [#allocation5], 0  ;;  %v119_v36 = vpack.c.bf16 %v93_v0, %v93_v0  ;;  %v1706_v37 = vld [vmem:[%s1855_s2 + $0x118] sm:$0xff]   ;;  %v1713_v39 = vld [vmem:[%s1855_s2 + $0x160] sm:$0xff]   ;;  %v78_v40 = vcombine.high %v74_v62, %v74_v62  ;;  %s1397_s19 = smov 96   ;;  %s1398_s20 = smov 32  }
  0x2b   :  { %v75_v44 = vld [vmem:[%s1854_s1 + $0x8] sm:$0x3f]  ;;  %vm853_vm2 = vcmask 261120   ;;  %vm855_vm3 = vcmask 517120   ;;  %vm906_vm4 = vcmask 523264   ;;  %vm977_vm8 = vcmask 1041408  }
  0x2c   :  { %1234 = vmatmul.mubr.msk.bf16.vlgmr.msra.gmra.mrb[4].mxu1 %vm517_vm1, %v73_v63  ;;  %1144 = vmatpush3.bf16.msra.mxu0 %v1687_v61  ;;  %v92_v42 = vrot.slane %v78_v40, %v1640_v41  ;;  %v102_v46 = vrot.slane %v75_v44, %v1640_v41  ;;  %v1313_v0 = vld [vmem:[%s1856_s3 + $0x24] ss:$8 sps:$4 sm:$0xff]  }
  0x2d   :  { %1164 = vmatpush3.bf16.msra.mxu1 %v1451_v2  ;;  %1145 = vmatprep.subr.bf16.mxu0 %v1695_v33  ;;  %v1296_v2 = vld [vmem:[%s1855_s2 + $0x120] sm:$0xff]  }
  0x2e   :  { %1165 = vmatprep.subr.bf16.mxu1 %v1463_v4  ;;  %716 = vmatprep.mubr.bf16.mxu1 %v119_v36  ;;  %v1297_v4 = vld [vmem:[%s1855_s2 + $0x168] sm:$0xff]   ;;  %v94_v43 = vcombine.high %v92_v42, %v92_v42 }
  0x2f   :  { %v1311_v36 = vld [vmem:[%s1856_s3 + $0x20] ss:$8 sps:$4 sm:$0xff]  }
  0x30   :  { %1146 = vmatpush3.bf16.msra.mxu0 %v1706_v37 }
  0x31   :  { %1166 = vmatpush3.bf16.msra.mxu1 %v1475_v6  ;;  %1147 = vmatprep.subr.bf16.mxu0 %v1713_v39  ;;  %v1298_v6 = vld [vmem:[%s1855_s2 + $0x128] sm:$0xff]  }
  0x32   :  { %1167 = vmatprep.subr.bf16.mxu1 %v1487_v8  ;;  %v1299_v8 = vld [vmem:[%s1855_s2 + $0x170] sm:$0xff]  }
  0x34   :  { %1148 = vmatpush3.bf16.msra.mxu0 %v1296_v2 }
  0x35   :  { %1168 = vmatpush3.bf16.msra.mxu1 %v1499_v10  ;;  %1149 = vmatprep.subr.bf16.mxu0 %v1297_v4  ;;  %v1300_v10 = vld [vmem:[%s1855_s2 + $0x130] sm:$0xff]  }
  0x36   :  { %1169 = vmatprep.subr.bf16.mxu1 %v1511_v12  ;;  %v1301_v12 = vld [vmem:[%s1855_s2 + $0x178] sm:$0xff]  }
  0x38   :  { %1150 = vmatpush3.bf16.msra.mxu0 %v1298_v6 }
  0x39   :  { %1170 = vmatpush3.bf16.msra.mxu1 %v1523_v14  ;;  %1151 = vmatprep.subr.bf16.mxu0 %v1299_v8  ;;  %v1302_v14 = vld [vmem:[%s1855_s2 + $0x138] sm:$0xff]  }
  0x3a   :  { %1171 = vmatprep.subr.bf16.mxu1 %v1535_v16  ;;  %v71_v16 = vpack.c.bf16 %v1648_v45, %v1648_v45 }
  0x3c   :  { %1152 = vmatpush3.bf16.msra.mxu0 %v1300_v10 }
  0x3d   :  { %1172 = vmatpush3.bf16.msra.mxu1 %v1547_v18  ;;  %1153 = vmatprep.subr.bf16.mxu0 %v1301_v12  ;;  %v121_v18 = vpack.c.bf16 %v94_v43, %v94_v43 }
  0x3e   :  { %1173 = vmatprep.subr.bf16.mxu1 %v1559_v20  ;;  %v110_v20 = vcombine.high %v102_v46, %v102_v46 }
  0x40   :  { %1154 = vmatpush3.bf16.msra.mxu0 %v1302_v14 }
  0x41   :  { %1174 = vmatpush3.bf16.msra.mxu1 %v1571_v22  ;;  %1185 = vmatprep.subr.bf16.mxu0 %v1445_v1  ;;  %v118_v22 = vpack.c.bf16 %v85_v34, %v85_v34  ;;  %v123_v1 = vpack.c.bf16 %v110_v20, %v110_v20 }
  0x42   :  { %1175 = vmatprep.subr.bf16.mxu1 %v1583_v24 }
  0x43   :  { %634 = vmatmul.mubr.bf16.vlgmr.msra.gmra.mrb[4].mxu0 %v71_v16 }
  0x44   :  { %1186 = vmatpush3.bf16.msra.mxu0 %v1457_v3  ;;  %756 = vmatprep.mubr.bf16.mxu0 %v121_v18  ;;  %v120_v3 = vpack.c.bf16 %v92_v42, %v92_v42 }
  0x45   :  { %1176 = vmatpush3.bf16.msra.mxu1 %v1595_v26  ;;  %1187 = vmatprep.subr.bf16.mxu0 %v1469_v5  ;;  %v95_v5 = vcombine.high %v75_v44, %v75_v44 }
  0x46   :  { %1177 = vmatprep.subr.bf16.mxu1 %v1607_v29 }
  0x48   :  { %1188 = vmatpush3.bf16.msra.mxu0 %v1481_v7  ;;  %v122_v7 = vpack.c.bf16 %v102_v46, %v102_v46 }
  0x49   :  { %1178 = vmatpush3.bf16.msra.mxu1 %v1619_v31  ;;  %1189 = vmatprep.subr.bf16.mxu0 %v1493_v9  ;;  %v109_v9 = vrot.slane %v95_v5, %v1640_v41 }
  0x4a   :  { %1207 = vmatprep.subr.bf16.mxu1 %v1635_v35 }
  0x4c   :  { %717 = vmatmul.mubr.bf16.vlgmr.msra.gmra.mrb[8].mxu1 %v118_v22  ;;  %1190 = vmatpush3.bf16.msra.mxu0 %v1505_v11  ;;  %v124_v11 = vpack.c.bf16 %v109_v9, %v109_v9 }
  0x4d   :  { %1208 = vmatpush3.bf16.msra.mxu1 %v1653_v50  ;;  %1191 = vmatprep.subr.bf16.mxu0 %v1517_v13  ;;  %v1305_v13 = vld [vmem:[%s1856_s3] ss:$8 sps:$4 sm:$0xff]  }
  0x4e   :  { %1209 = vmatprep.subr.bf16.mxu1 %v1665_v56  ;;  %796 = vmatprep.mubr.bf16.mxu1 %v123_v1 }
  0x50   :  { %1192 = vmatpush3.bf16.msra.mxu0 %v1529_v15  ;;  %v1307_v15 = vld [vmem:[%s1856_s3 + $0x4] ss:$8 sps:$4 sm:$0xff]  }
  0x51   :  { %1210 = vmatpush3.bf16.msra.mxu1 %v1673_v59  ;;  %1193 = vmatprep.subr.bf16.mxu0 %v1541_v17  ;;  %v1310_v17 = vld [vmem:[%s1856_s3 + $0x14] ss:$8 sps:$4 sm:$0xff]  }
  0x52   :  { %1211 = vmatprep.subr.bf16.mxu1 %v1681_v60 }
  0x54   :  { %1194 = vmatpush3.bf16.msra.mxu0 %v1553_v19  ;;  %v1308_v19 = vld [vmem:[%s1856_s3 + $0x10] ss:$8 sps:$4 sm:$0xff]  }
  0x55   :  { %1212 = vmatpush3.bf16.msra.mxu1 %v1687_v61  ;;  %1195 = vmatprep.subr.bf16.mxu0 %v1565_v21 }
  0x56   :  { %1213 = vmatprep.subr.bf16.mxu1 %v1695_v33 }
  0x58   :  { %1196 = vmatpush3.bf16.msra.mxu0 %v1577_v23 }
  0x59   :  { %1214 = vmatpush3.bf16.msra.mxu1 %v1706_v37  ;;  %1197 = vmatprep.subr.bf16.mxu0 %v1589_v25 }
  0x5a   :  { %1215 = vmatprep.subr.bf16.mxu1 %v1713_v39 }
  0x5c   :  { %1198 = vmatpush3.bf16.msra.mxu0 %v1601_v27 }
  0x5d   :  { %1216 = vmatpush3.bf16.msra.mxu1 %v1296_v2  ;;  %1199 = vmatprep.subr.bf16.mxu0 %v1613_v30  ;;  %v1316_v2 = vld [vmem:[%s1856_s3 + $0x34] ss:$8 sps:$4 sm:$0xff]  }
  0x5e   :  { %1217 = vmatprep.subr.bf16.mxu1 %v1297_v4 }
  0x60   :  { %1200 = vmatpush3.bf16.msra.mxu0 %v1625_v32 }
  0x61   :  { %1218 = vmatpush3.bf16.msra.mxu1 %v1298_v6  ;;  %910 = vmatprep.subr.bf16.mxu0 %v1307_v15 }
  0x62   :  { %1219 = vmatprep.subr.bf16.mxu1 %v1299_v8  ;;  %v1314_v8 = vld [vmem:[%s1856_s3 + $0x30] ss:$8 sps:$4 sm:$0xff]   ;;  %s1399_s3 = smov [#allocation4]  }
  0x63   :  { %757 = vmatmul.mubr.bf16.vlgmr.msra.gmra.mrb[8].mxu0 %v120_v3  ;;  %s1009_s0 = sshll.u32 %s1399_s3, 4  ;;  %s1010_s0 = int_to_ptr.vmem [resolvable:$true] %s1009_s0 }
  0x64   :  { %911 = vmatpush1.bf16.msra.mxu0 %v1305_v13  ;;  %s1323_s21 = scalar_lea.vmem %s1010_s0, 32  ;;  %p1328_p1 = scmp.lt.s32.totalorder %s1010_s0, %s1010_s0 }
  0x65   :  { %1220 = vmatpush3.bf16.msra.mxu1 %v1300_v10  ;;  %912 = vmatprep.subr.bf16.mxu0 %v1310_v17  ;;  %p1324_p0 = scmp.ne.s32.totalorder %s1010_s0, %s1323_s21  ;;  %p1329_p2 = scmp.lt.s32.totalorder %s1323_s21, %s1323_s21 }
  0x66   :  { %1221 = vmatprep.subr.bf16.mxu1 %v1301_v12  ;;  %v1396_v12 = vmov 0  }
  0x67   :  { %942 = vmatprep.mubr.bf16.mxu0 %v1396_v12  ;;  %p1330_p3 = por %p1329_p2, %p1328_p1 }
  0x68   :  { %913 = vmatpush1.bf16.msra.mxu0 %v1308_v19 }
  0x69   :  { %1222 = vmatpush3.bf16.msra.mxu1 %v1302_v14  ;;  %914 = vmatprep.subr.bf16.mxu0 %v1313_v0  ;;  %p1331_p4 = pnand %p1330_p3, %p1324_p0 }
  0x6a   :  { %1237 = vmatprep.subr.bf16.mxu1 %v1394_v38 }
  0x6c   :  { %797 = vmatmul.mubr.bf16.vlgmr.msra.gmra.mrb[12].mxu1 %v122_v7  ;;  %915 = vmatpush1.bf16.msra.mxu0 %v1311_v36 }
  0x6d   :  { %1238 = vmatpush3.bf16.msra.mxu1 %v1660_v55  ;;  %1239 = vmatprep.mubr.msk.bf16.mxu1 %vm1395_vm0, %v1394_v38 }
  0x6e   :  { %916 = vmatprep.subr.bf16.mxu0 %v1316_v2 }
  0x70   :  { %917 = vmatpush1.bf16.msra.mxu0 %v1314_v8 }
  0x74   :  { %1240 = vmatmul.mubr.msk.bf16.vlgmr.msra.gmra.mrb[16].mxu1 %vm517_vm1, %v124_v11 }
  0xf6   :  { %v1111_v21 = vpop.f32.mrb[0].mxu0 }
  0xf7   :  { %v1133_v23 = vpop.f32.mrb[0].mxu1  ;;  %v1112_v24 = vpop.f32.mrb[1].mxu0 }
  0xf8   :  { %v1134_v25 = vpop.f32.mrb[1].mxu1  ;;  %v1113_v26 = vadd.f32 %v1112_v24, %v1111_v21  ;;  %v1114_v30 = vpop.f32.mrb[2].mxu0  ;;  %v974_v21 = vand.u32 127, %v31_v28 }
  0xf9   :  { %v1135_v27 = vadd.f32 %v1134_v25, %v1133_v23  ;;  %v1136_v29 = vpop.f32.mrb[2].mxu1  ;;  %v1115_v32 = vpop.f32.mrb[3].mxu0 }
  0xfa   :  { %v1137_v31 = vpop.f32.mrb[3].mxu1  ;;  %vm975_vm6 = vcmp.lt.s32.totalorder %v974_v21, 10 }
  0xfb   :  { %v596_v35 = vadd.f32 %v1135_v27, %v1113_v26 }
  0xff   :  { %v675_v38 = vpop.f32.mrb[4].mxu1 }
 0x100   :  { %v1235_v41 = vpop.f32.mrb[5].mxu1 }
 0x101   :  { %v678_v45 = vpop.f32.mrb[6].mxu1 }
 0x102   :  { %v1236_v47 = vpop.f32.mrb[7].mxu1 }
 0x116   :  { %v1155_v48 = vpop.f32.mrb[4].mxu0 }
 0x117   :  { %v1156_v49 = vpop.f32.mrb[5].mxu0 }
 0x118   :  { %v1157_v50 = vadd.f32 %v1156_v49, %v1155_v48  ;;  %v1158_v51 = vpop.f32.mrb[6].mxu0 }
 0x119   :  { %v1159_v52 = vpop.f32.mrb[7].mxu0 }
 0x11a   :  { %v636_v53 = vadd.f32 %v1157_v50, %v596_v35 }
 0x11c   :  { %v676_v54 = vadd.f32 %v675_v38, %v636_v53 }
 0x11f   :  { %v1179_v55 = vpop.f32.mrb[8].mxu1 }
 0x120   :  { %v1180_v56 = vpop.f32.mrb[9].mxu1 }
 0x121   :  { %v1181_v57 = vadd.f32 %v1180_v56, %v1179_v55  ;;  %v1182_v58 = vpop.f32.mrb[10].mxu1 }
 0x122   :  { %v1183_v59 = vpop.f32.mrb[11].mxu1 }
 0x136   :  { %v1201_v60 = vpop.f32.mrb[8].mxu0 }
 0x137   :  { %v1202_v61 = vpop.f32.mrb[9].mxu0 }
 0x138   :  { %v1203_v62 = vadd.f32 %v1202_v61, %v1201_v60  ;;  %v1204_v63 = vpop.f32.mrb[10].mxu0 }
 0x139   :  { %v1205_v33 = vpop.f32.mrb[11].mxu0 }
 0x13a   :  { %v759_v34 = vadd.f32 %v1203_v62, %v1181_v57 }
 0x13f   :  { %v1223_v37 = vpop.f32.mrb[12].mxu1 }
 0x140   :  { %v1224_v39 = vpop.f32.mrb[13].mxu1 }
 0x141   :  { %v1225_v4 = vadd.f32 %v1224_v39, %v1223_v37  ;;  %v1226_v6 = vpop.f32.mrb[14].mxu1 }
 0x142   :  { %v1227_v40 = vpop.f32.mrb[15].mxu1 }
 0x143   :  { %v799_v10 = vadd.f32 %v1225_v4, %v759_v34 }
 0x147   :  { %v838_v42 = vpop.f32.mrb[16].mxu1 }
 0x148   :  { %v839_v14 = vadd.f32 %v838_v42, %v799_v10  ;;  %v1241_v43 = vpop.f32.mrb[17].mxu1 }
 0x149   :  { %v841_v16 = vpop.f32.mrb[18].mxu1 }
 0x14a   :  { %v1242_v44 = vpop.f32.mrb[19].mxu1  ;;  %845 = vrot.lane.b32.xlu0 %v839_v14, %s1397_s19 }
 0x14e   :  { %849 = vrot.lane.b32.xlu0 %v839_v14, %s1398_s20 }
 0x1bc   :  { %v846_v18 = vpop.permute.xlu0 %845 }
 0x1bd   :  { %v848_v20 = vsub.f32 %v676_v54, %v846_v18 }
 0x1c0   :  { %v850_v46 = vpop.permute.xlu0 %849 }
 0x1c1   :  { %v852_v22 = vadd.f32 %v850_v46, %v676_v54 }
 0x1c3   :  { %v854_v1 = vsel %vm853_vm2, %v848_v20, %v852_v22 }
 0x1c4   :  { %v857_v3 = vpack.c.bf16 %v854_v1, %v854_v1  ;;  %856 = vst.msk [vmem:[#allocation4] sm:$0x3] %vm855_vm3, %v854_v1 }
 0x1c6   :  { %1093 = vmatmul.mubr.msk.bf16.vlgmr.msra.gmra.mrb[12].mxu0 %vm906_vm4, %v857_v3 }
 0x299   :  { %v944_v5 = vpop.f32.mrb[12].mxu0 }
 0x29a   :  { %v963_v7 = vmul.f32 %v944_v5, %v944_v5  ;;  %v946_v9 = vpop.f32.mrb[13].mxu0 }
 0x29b   :  { %v953_v11 = vcombine.low %v944_v5, %v946_v9  ;;  %v964_v13 = vmul.f32 %v946_v9, %v946_v9  ;;  %v948_v15 = vpop.f32.mrb[14].mxu0 }
 0x29c   :  { %v949_v17 = vpop.f32.mrb[15].mxu0 }
 0x29d   :  { %v965_v19 = vadd.f32 %v964_v13, %v963_v7  ;;  %1094 = vst.sshfl [vmem:[#allocation6] sm:$0x33 pattern:$0x76325410] %v953_v11 }
 0x29f   :  { %1317 = vrsqrt.f32 %v965_v19  ;;  %vm968_vm5 = vcmp.eq.f32.partialorder %v965_v19, inf  ;;  %v971_v25 = vand.u32 2147483648, %v965_v19  ;;  %vm970_vm7 = vcmp.eq.f32.partialorder %v965_v19, 0.0 }
 0x2a9   :  { %v1318_v23 = vpop.eup %1317 }
 0x2aa   :  { %v967_v24 = vmul.f32 %v1318_v23, %v965_v19 }
 0x2ac   :  { %v969_v26 = vsel %vm968_vm5, %v965_v19, %v967_v24 }
 0x2ad   :  { %v972_v27 = vsel %vm970_vm7, %v971_v25, %v969_v26 }
 0x2ae   :  { %v976_v29 = vsel %vm975_vm6, %v972_v27, -inf }
 0x2af   :  { %v978_v30 = vsel %vm977_vm8, %v976_v29, -inf }
 0x2b0   :  { %979 = vmax.xlane.f32.xlu1 %v978_v30 }
 0x33d   :  { %v980_v31 = vpop.xlane.xlu1 %979 }
 0x33e   :  { %v981_v32 = vsub.f32 %v976_v29, %v980_v31 }
 0x340   :  { %v982_v35 = vmul.f32 1.442695, %v981_v32 }
 0x342   :  { %1319 = vpow2.f32 %v982_v35 }
 0x34c   :  { %v1320_v38 = vpop.eup %1319 }
 0x34d   :  { %v984_v28 = vsel %vm975_vm6, %v1320_v38, 0.0 }
 0x34e   :  { %v985_v41 = vsel %vm977_vm8, %v984_v28, 0.0 }
 0x34f   :  { %986 = vadd.xlane.f32.xlu1 %v985_v41 }
 0x350   :  { %1334 = shalt.err (!%p1331_p4)
}
 0x351   :  { %s1335_s24 = scalar_lea.hbm %s1858_s5, 32 }
 0x352   :  { %p1336_p5 = scmp.ne.s32.totalorder %s1858_s5, %s1335_s24  ;;  %p1339_p6 = scmp.lt.u32.totalorder %s1335_s24, %s1858_s5 }
 0x354   :  { %p1341_p7 = pnand %p1339_p6, %p1336_p5 }
 0x356   :  { %1344 = shalt.err (!%p1341_p7)
}
 0x357   :  { %1012 = dma.vmem_to_hbm [thread:$0]  %s1010_s0, 32, %s1858_s5, [#allocation5]  }
 0x358   :  { %s1400_s29 = smov [#allocation6]  }
 0x359   :  { %s1019_s30 = sshll.u32 %s1400_s29, 4  ;;  %s1020_s30 = int_to_ptr.vmem [resolvable:$true] %s1019_s30 }
 0x35a   :  { %s1345_s7 = scalar_lea.vmem %s1020_s30, 64  ;;  %p1350_p9 = scmp.lt.s32.totalorder %s1020_s30, %s1020_s30 }
 0x35b   :  { %p1346_p8 = scmp.ne.s32.totalorder %s1020_s30, %s1345_s7  ;;  %p1351_p10 = scmp.lt.s32.totalorder %s1345_s7, %s1345_s7 }
 0x35d   :  { %p1352_p11 = por %p1351_p10, %p1350_p9 }
 0x35f   :  { %p1353_p12 = pnand %p1352_p11, %p1346_p8 }
 0x361   :  { %1356 = shalt.err (!%p1353_p12)
}
 0x362   :  { %s1357_s10 = scalar_lea.hbm %s1859_s6, 64 }
 0x363   :  { %p1358_p13 = scmp.ne.s32.totalorder %s1859_s6, %s1357_s10  ;;  %p1361_p0 = scmp.lt.u32.totalorder %s1357_s10, %s1859_s6 }
 0x365   :  { %p1363_p1 = pnand %p1361_p0, %p1358_p13 }
 0x367   :  { %1366 = shalt.err (!%p1363_p1)
}
 0x368   :  { %1022 = dma.vmem_to_hbm [thread:$0]  %s1020_s30, 64, %s1859_s6, [#allocation5]  }
 0x369   :  { %s1401_s16 = smov [#allocation2]  }
 0x36a   :  { %s999_s17 = sshll.u32 %s1401_s16, 4  ;;  %s1000_s17 = int_to_ptr.vmem [resolvable:$true] %s999_s17 }
 0x36b   :  { %s1367_s18 = scalar_lea.vmem %s1000_s17, 32  ;;  %p1372_p3 = scmp.lt.s32.totalorder %s1000_s17, %s1000_s17 }
 0x36c   :  { %p1368_p2 = scmp.ne.s32.totalorder %s1000_s17, %s1367_s18  ;;  %p1373_p4 = scmp.lt.s32.totalorder %s1367_s18, %s1367_s18 }
 0x36e   :  { %p1374_p5 = por %p1373_p4, %p1372_p3 }
 0x370   :  { %p1375_p6 = pnand %p1374_p5, %p1368_p2 }
 0x3dc   :  { %v987_v45 = vpop.xlane.xlu1 %986 }
 0x3dd   :  { %1321 = vlog2.f32 %v987_v45 }
 0x3e7   :  { %v1322_v47 = vpop.eup %1321 }
 0x3e8   :  { %v989_v48 = vmul.f32 0.6931472, %v1322_v47 }
 0x3ea   :  { %v990_v49 = vsub.f32 %v981_v32, %v989_v48 }
 0x3ec   :  { %v991_v50 = vsel %vm975_vm6, %v990_v49, 0.0 }
 0x3ed   :  { %992 = vst [vmem:[#allocation2] sm:$0x3] %v991_v50 }
 0x3ee   :  { %1378 = shalt.err (!%p1375_p6)
}
 0x3ef   :  { %s1379_s20 = scalar_lea.hbm %s1857_s4, 32 }
 0x3f0   :  { %p1380_p7 = scmp.ne.s32.totalorder %s1857_s4, %s1379_s20  ;;  %p1383_p8 = scmp.lt.u32.totalorder %s1379_s20, %s1857_s4 }
 0x3f2   :  { %p1385_p9 = pnand %p1383_p8, %p1380_p7 }
 0x3f4   :  { %1388 = shalt.err (!%p1385_p9)
}
 0x3f5   :  { %1002 = dma.vmem_to_hbm [thread:$0]  %s1000_s17, 32, %s1857_s4, [#allocation3]  }
 0x3f6   :  { %1389 = dma.done.wait [#allocation3], 32  }
 0x3f7   :  { %1390 = vsyncadd [#allocation3], 4294967264 }
 0x3f8   :  { %1391 = dma.done.wait [#allocation5], 96  }
 0x3f9   :  { %1392 = vsyncadd [#allocation5], 4294967200 }
 0x3fa   :  { %1032 = vsyncpa [#allocation3], 1 }
 0x3fb   :  { %1033 = vsyncpa [#allocation5], 1 }

</bundles_post_ra>
